<compile_context>
chip_gen: v5e
topology: v5e:2x2
jax: 0.10.0
libtpu: 0.0.40
codegen_flags: <defaults>
</compile_context>

<pallas_src>
import functools

import jax
import jax.numpy as jnp
from jax.experimental import pallas as pl
from jax.experimental.pallas import tpu as pltpu


def _round_up(v, m):
    return (v + m - 1) // m * m


def _decoder_kernel(x_ref, r_ref, w1x_ref, w1r_ref, b1_ref, w2_ref, b2_ref,
                    w3_ref, b3_ref, out_ref):
    """One (batch, row-tile) block of the 3-layer MLP + softplus head.

    Block shapes:
      x_ref   : (1, TM, input_dim)
      r_ref   : (1, 1, latent) [broadcast case] or (1, TM, latent)
      w*_ref  : full weight matrices (in_features, out_features), bf16/f32
      b*_ref  : (1, out_features), f32
      out_ref : (1, TM, 2*output_dim), f32 — columns [mean | softplus(sigma)]
    """
    cd = w1x_ref.dtype                      # MXU compute dtype (bf16 or f32)
    x = x_ref[0].astype(cd)                 # (TM, input_dim)

    rr = r_ref[0]                           # (1, latent) or (TM, latent)
    if rr.shape[0] != x.shape[0]:
        # Broadcast the per-task representation across the row tile (VMEM
        # only; replaces the PyTorch r.repeat(1, num_targets, 1)).
        rr = jnp.broadcast_to(rr, (x.shape[0], rr.shape[1]))
    rr = rr.astype(cd)

    # Layer 1: split matmul avoids materializing cat([x, r]) in HBM.
    h = (jnp.dot(x, w1x_ref[...], preferred_element_type=jnp.float32)
         + jnp.dot(rr, w1r_ref[...], preferred_element_type=jnp.float32)
         + b1_ref[...])
    h = jnp.maximum(h, 0.0)

    # Layer 2.
    h = jnp.dot(h.astype(cd), w2_ref[...],
                preferred_element_type=jnp.float32) + b2_ref[...]
    h = jnp.maximum(h, 0.0)

    # Layer 3 -> raw [mean | sigma_pre].
    o = jnp.dot(h.astype(cd), w3_ref[...],
                preferred_element_type=jnp.float32) + b3_ref[...]

    # Softplus only on the sigma half; single lane-masked select keeps one
    # dense combined store (no width-output_dim slicing inside the kernel).
    d_out = out_ref.shape[-1] // 2
    col = jax.lax.broadcasted_iota(jnp.int32, o.shape, 1)
    out = jnp.where(col < d_out, o, jnp.logaddexp(o, 0.0))  # stable softplus
    out_ref[0] = out.astype(out_ref.dtype)


def standard_decoder_forward(x, r, params, *, output_dim, tile_rows=1024,
                             use_bf16_matmul=True):
    """Pallas implementation of StandardDecoder.forward.

    Args:
      x: (batch, num_targets, input_dim) float32 target locations.
      r: (batch, 1, latent_dim) or (batch, num_targets, latent_dim) float32.
      params: dict with w1 (input+latent, latent), b1 (1, latent),
              w2 (latent, latent), b2 (1, latent),
              w3 (latent, 2*output_dim), b3 (1, 2*output_dim).
      output_dim: int.
      tile_rows: target rows per grid step (sweep 512-2048 for large inputs).
      use_bf16_matmul: feed bf16 into the MXU (f32 accumulate / elementwise).

    Returns:
      (mean, sigma), each (batch, num_targets, output_dim) float32.
    """
    batch, num_targets, input_dim = x.shape
    latent_dim = r.shape[-1]
    r_is_broadcast = (r.shape[1] == 1)
    two_out = 2 * output_dim

    # Row tile: a multiple of 8 sublanes (or the full row extent).
    tm = min(tile_rows, _round_up(num_targets, 8))
    if tm != num_targets:
        tm = _round_up(tm, 8)
    grid = (batch, pl.cdiv(num_targets, tm))

    cd = jnp.bfloat16 if use_bf16_matmul else jnp.float32
    w1 = params["w1"]
    w1x = w1[:input_dim].astype(cd)          # (input_dim, latent)
    w1r = w1[input_dim:].astype(cd)          # (latent,    latent)
    w2 = params["w2"].astype(cd)
    w3 = params["w3"].astype(cd)
    b1 = params["b1"].astype(jnp.float32)
    b2 = params["b2"].astype(jnp.float32)
    b3 = params["b3"].astype(jnp.float32)

    # Weights/biases: constant index_map -> VMEM-resident across the grid.
    def const_spec(shape):
        return pl.BlockSpec(shape, lambda b, t: (0, 0))

    if r_is_broadcast:
        r_spec = pl.BlockSpec((1, 1, latent_dim), lambda b, t: (b, 0, 0))
    else:
        r_spec = pl.BlockSpec((1, tm, latent_dim), lambda b, t: (b, t, 0))

    out = pl.pallas_call(
        _decoder_kernel,
        out_shape=jax.ShapeDtypeStruct((batch, num_targets, two_out),
                                       jnp.float32),
        grid=grid,
        in_specs=[
            pl.BlockSpec((1, tm, input_dim), lambda b, t: (b, t, 0)),
            r_spec,
            const_spec(w1x.shape), const_spec(w1r.shape), const_spec(b1.shape),
            const_spec(w2.shape), const_spec(b2.shape),
            const_spec(w3.shape), const_spec(b3.shape),
        ],
        out_specs=pl.BlockSpec((1, tm, two_out), lambda b, t: (b, t, 0)),
        compiler_params=pltpu.CompilerParams(
            dimension_semantics=("parallel", "parallel")),
    )(x, r, w1x, w1r, b1, w2, b2, w3, b3)

    # Width-output_dim split is glue only; let XLA do it outside the kernel.
    mean = out[..., :output_dim]
    sigma = out[..., output_dim:]
    return mean, sigma


def init_decoder_params(key, input_dim, latent_dim, output_dim):
    """Small-normal weights, zero biases, stored (in_features, out_features)."""
    k1, k2, k3 = jax.random.split(key, 3)
    d_in = input_dim + latent_dim
    std = 1e-1
    return {
        "w1": std * jax.random.normal(k1, (d_in, latent_dim), jnp.float32),
        "b1": jnp.zeros((1, latent_dim), jnp.float32),
        "w2": std * jax.random.normal(k2, (latent_dim, latent_dim), jnp.float32),
        "b2": jnp.zeros((1, latent_dim), jnp.float32),
        "w3": std * jax.random.normal(k3, (latent_dim, 2 * output_dim),
                                      jnp.float32),
        "b3": jnp.zeros((1, 2 * output_dim), jnp.float32),
    }


if __name__ == "__main__":
    # Small shapes; tile_rows=64 with num_targets=128 exercises a (2, 2) grid
    # (multi-tile pipelining + per-batch broadcast-r path).
    batch, num_targets = 2, 128
    input_dim, latent_dim, output_dim = 2, 32, 1

    key = jax.random.PRNGKey(0)
    kx, kr, kp = jax.random.split(key, 3)

    x = jax.random.normal(kx, (batch, num_targets, input_dim), jnp.float32)
    r = jax.random.normal(kr, (batch, 1, latent_dim), jnp.float32)
    params = init_decoder_params(kp, input_dim, latent_dim, output_dim)

    fwd = functools.partial(standard_decoder_forward, output_dim=output_dim,
                            tile_rows=64)
    mean, sigma = fwd(x, r, params)
    jax.block_until_ready((mean, sigma))

    assert mean.shape == (batch, num_targets, output_dim)
    assert sigma.shape == (batch, num_targets, output_dim)

    # Plain-JAX f32 reference (same math as the PyTorch module).
    r_rep = jnp.broadcast_to(r, (batch, num_targets, latent_dim))
    z = jnp.concatenate([x, r_rep], -1).reshape(batch * num_targets, -1)
    h = jnp.maximum(z @ params["w1"] + params["b1"], 0.0)
    h = jnp.maximum(h @ params["w2"] + params["b2"], 0.0)
    o = h @ params["w3"] + params["b3"]
    ref_mean = o[:, :output_dim].reshape(batch, num_targets, output_dim)
    ref_sigma = jnp.logaddexp(o[:, output_dim:], 0.0).reshape(
        batch, num_targets, output_dim)

    # bf16 MXU operands vs f32 reference -> loose tolerance.
    assert jnp.allclose(mean, ref_mean, atol=2e-2), "mean mismatch"
    assert jnp.allclose(sigma, ref_sigma, atol=2e-2), "sigma mismatch"

    print("KERNEL_OK")
</pallas_src>

<mosaic_0001>
module attributes {stable_mosaic.version = 11 : i64} {
  func.func @_decoder_kernel(%arg0: i32, %arg1: i32, %arg2: memref<1x64x2xf32, #tpu.memory_space<vmem>>, %arg3: memref<1x1x32xf32, #tpu.memory_space<vmem>>, %arg4: memref<2x32xbf16, #tpu.memory_space<vmem>>, %arg5: memref<32x32xbf16, #tpu.memory_space<vmem>>, %arg6: memref<1x32xf32, #tpu.memory_space<vmem>>, %arg7: memref<32x32xbf16, #tpu.memory_space<vmem>>, %arg8: memref<1x32xf32, #tpu.memory_space<vmem>>, %arg9: memref<32x2xbf16, #tpu.memory_space<vmem>>, %arg10: memref<1x2xf32, #tpu.memory_space<vmem>>, %arg11: memref<1x64x2xf32, #tpu.memory_space<vmem>>) attributes {dimension_semantics = [#tpu.dimension_semantics<parallel>, #tpu.dimension_semantics<parallel>], iteration_bounds = array<i64: 2, 2>, scalar_prefetch = 0 : i64, scratch_operands = 0 : i64, tpu.core_type = #tpu.core_type<tc>, window_params = [{transform_indices = @transform_0, window_bounds = array<i64: 1, 64, 2>}, {transform_indices = @transform_1, window_bounds = array<i64: 1, 1, 32>}, {pipeline_mode = #tpu.pipeline_mode<synchronous>, transform_indices = @transform_2, window_bounds = array<i64: 2, 32>}, {pipeline_mode = #tpu.pipeline_mode<synchronous>, transform_indices = @transform_3, window_bounds = array<i64: 32, 32>}, {pipeline_mode = #tpu.pipeline_mode<synchronous>, transform_indices = @transform_4, window_bounds = array<i64: 1, 32>}, {pipeline_mode = #tpu.pipeline_mode<synchronous>, transform_indices = @transform_5, window_bounds = array<i64: 32, 32>}, {pipeline_mode = #tpu.pipeline_mode<synchronous>, transform_indices = @transform_6, window_bounds = array<i64: 1, 32>}, {pipeline_mode = #tpu.pipeline_mode<synchronous>, transform_indices = @transform_7, window_bounds = array<i64: 32, 2>}, {pipeline_mode = #tpu.pipeline_mode<synchronous>, transform_indices = @transform_8, window_bounds = array<i64: 1, 2>}, {transform_indices = @transform_9, window_bounds = array<i64: 1, 64, 2>}]} {
    %c0 = arith.constant 0 : index
    %c0_0 = arith.constant 0 : index
    %c0_1 = arith.constant 0 : index
    %0 = vector.load %arg2[%c0, %c0_0, %c0_1] : memref<1x64x2xf32, #tpu.memory_space<vmem>>, vector<1x64x2xf32>
    %1 = vector.shape_cast %0 : vector<1x64x2xf32> to vector<64x2xf32>
    %2 = arith.truncf %1 : vector<64x2xf32> to vector<64x2xbf16>
    %c0_2 = arith.constant 0 : index
    %c0_3 = arith.constant 0 : index
    %c0_4 = arith.constant 0 : index
    %3 = vector.load %arg3[%c0_2, %c0_3, %c0_4] : memref<1x1x32xf32, #tpu.memory_space<vmem>>, vector<1x1x32xf32>
    %4 = vector.shape_cast %3 : vector<1x1x32xf32> to vector<1x32xf32>
    %5 = vector.shape_cast %4 : vector<1x32xf32> to vector<1x32xf32>
    %6 = vector.broadcast %5 : vector<1x32xf32> to vector<64x32xf32>
    %7 = arith.truncf %6 : vector<64x32xf32> to vector<64x32xbf16>
    %c0_5 = arith.constant 0 : index
    %c0_6 = arith.constant 0 : index
    %8 = vector.load %arg4[%c0_5, %c0_6] : memref<2x32xbf16, #tpu.memory_space<vmem>>, vector<2x32xbf16>
    %cst = arith.constant dense<0.000000e+00> : vector<64x32xf32>
    %9 = tpu.matmul %2, %8, %cst {dimension_numbers = #tpu.dot_dimension_numbers<[1], [0], [0], [1], [0, 0, 1, 1], [], []>} : vector<64x2xbf16>, vector<2x32xbf16>, vector<64x32xf32> -> vector<64x32xf32>
    %c0_7 = arith.constant 0 : index
    %c0_8 = arith.constant 0 : index
    %10 = vector.load %arg5[%c0_7, %c0_8] : memref<32x32xbf16, #tpu.memory_space<vmem>>, vector<32x32xbf16>
    %cst_9 = arith.constant dense<0.000000e+00> : vector<64x32xf32>
    %11 = tpu.matmul %7, %10, %cst_9 {dimension_numbers = #tpu.dot_dimension_numbers<[1], [0], [0], [1], [0, 0, 1, 1], [], []>} : vector<64x32xbf16>, vector<32x32xbf16>, vector<64x32xf32> -> vector<64x32xf32>
    %12 = arith.addf %9, %11 : vector<64x32xf32>
    %c0_10 = arith.constant 0 : index
    %c0_11 = arith.constant 0 : index
    %13 = vector.load %arg6[%c0_10, %c0_11] : memref<1x32xf32, #tpu.memory_space<vmem>>, vector<1x32xf32>
    %14 = vector.broadcast %13 : vector<1x32xf32> to vector<64x32xf32>
    %15 = arith.addf %12, %14 : vector<64x32xf32>
    %cst_12 = arith.constant 0.000000e+00 : f32
    %16 = vector.broadcast %cst_12 : f32 to vector<64x32xf32>
    %17 = arith.maximumf %15, %16 : vector<64x32xf32>
    %18 = arith.truncf %17 : vector<64x32xf32> to vector<64x32xbf16>
    %c0_13 = arith.constant 0 : index
    %c0_14 = arith.constant 0 : index
    %19 = vector.load %arg7[%c0_13, %c0_14] : memref<32x32xbf16, #tpu.memory_space<vmem>>, vector<32x32xbf16>
    %cst_15 = arith.constant dense<0.000000e+00> : vector<64x32xf32>
    %20 = tpu.matmul %18, %19, %cst_15 {dimension_numbers = #tpu.dot_dimension_numbers<[1], [0], [0], [1], [0, 0, 1, 1], [], []>} : vector<64x32xbf16>, vector<32x32xbf16>, vector<64x32xf32> -> vector<64x32xf32>
    %c0_16 = arith.constant 0 : index
    %c0_17 = arith.constant 0 : index
    %21 = vector.load %arg8[%c0_16, %c0_17] : memref<1x32xf32, #tpu.memory_space<vmem>>, vector<1x32xf32>
    %22 = vector.broadcast %21 : vector<1x32xf32> to vector<64x32xf32>
    %23 = arith.addf %20, %22 : vector<64x32xf32>
    %cst_18 = arith.constant 0.000000e+00 : f32
    %24 = vector.broadcast %cst_18 : f32 to vector<64x32xf32>
    %25 = arith.maximumf %23, %24 : vector<64x32xf32>
    %26 = arith.truncf %25 : vector<64x32xf32> to vector<64x32xbf16>
    %c0_19 = arith.constant 0 : index
    %c0_20 = arith.constant 0 : index
    %27 = vector.load %arg9[%c0_19, %c0_20] : memref<32x2xbf16, #tpu.memory_space<vmem>>, vector<32x2xbf16>
    %cst_21 = arith.constant dense<0.000000e+00> : vector<64x2xf32>
    %28 = tpu.matmul %26, %27, %cst_21 {dimension_numbers = #tpu.dot_dimension_numbers<[1], [0], [0], [1], [0, 0, 1, 1], [], []>} : vector<64x32xbf16>, vector<32x2xbf16>, vector<64x2xf32> -> vector<64x2xf32>
    %c0_22 = arith.constant 0 : index
    %c0_23 = arith.constant 0 : index
    %29 = vector.load %arg10[%c0_22, %c0_23] : memref<1x2xf32, #tpu.memory_space<vmem>>, vector<1x2xf32>
    %30 = vector.broadcast %29 : vector<1x2xf32> to vector<64x2xf32>
    %31 = arith.addf %28, %30 : vector<64x2xf32>
    %32 = tpu.iota {dimensions = array<i32: 1>} : vector<64x2xi32>
    %c1_i32 = arith.constant 1 : i32
    %33 = vector.broadcast %c1_i32 : i32 to vector<64x2xi32>
    %34 = arith.cmpi slt, %32, %33 : vector<64x2xi32>
    %cst_24 = arith.constant 0.000000e+00 : f32
    %35 = vector.broadcast %cst_24 : f32 to vector<64x2xf32>
    %36 = arith.maximumf %31, %35 : vector<64x2xf32>
    %37 = vector.broadcast %cst_24 : f32 to vector<64x2xf32>
    %38 = arith.subf %31, %37 : vector<64x2xf32>
    %39 = arith.cmpf one, %38, %38 : vector<64x2xf32>
    %40 = vector.broadcast %cst_24 : f32 to vector<64x2xf32>
    %41 = arith.addf %31, %40 : vector<64x2xf32>
    %42 = math.absf %38 : vector<64x2xf32>
    %cst_25 = arith.constant 0.000000e+00 : f32
    %43 = vector.broadcast %cst_25 : f32 to vector<64x2xf32>
    %44 = arith.subf %43, %42 : vector<64x2xf32>
    %45 = math.exp %44 : vector<64x2xf32>
    %46 = math.log1p %45 : vector<64x2xf32>
    %47 = arith.addf %36, %46 : vector<64x2xf32>
    %48 = arith.select %39, %41, %47 : vector<64x2xi1>, vector<64x2xf32>
    %49 = arith.select %34, %31, %48 : vector<64x2xi1>, vector<64x2xf32>
    %c0_26 = arith.constant 0 : index
    %c0_27 = arith.constant 0 : index
    %c0_28 = arith.constant 0 : index
    %50 = vector.load %arg11[%c0_26, %c0_27, %c0_28] : memref<1x64x2xf32, #tpu.memory_space<vmem>>, vector<1x64x2xf32>
    %51 = vector.shape_cast %50 : vector<1x64x2xf32> to vector<64x2xf32>
    %52 = vector.shape_cast %49 : vector<64x2xf32> to vector<1x64x2xf32>
    tpu.vector_store %arg11[%c0_26, %c0_27, %c0_28], %52 {strides = array<i32>} : memref<1x64x2xf32, #tpu.memory_space<vmem>>, vector<1x64x2xf32>,
    return
  }
  func.func @transform_0(%arg0: i32, %arg1: i32) -> (i32, i32, i32) {
    %c0_i32 = arith.constant 0 : i32
    %c0_i32_0 = arith.constant 0 : i32
    return %arg0, %arg1, %c0_i32 : i32, i32, i32
  }
  func.func @transform_1(%arg0: i32, %arg1: i32) -> (i32, i32, i32) {
    %c0_i32 = arith.constant 0 : i32
    %c0_i32_0 = arith.constant 0 : i32
    %c0_i32_1 = arith.constant 0 : i32
    return %arg0, %c0_i32, %c0_i32_0 : i32, i32, i32
  }
  func.func @transform_2(%arg0: i32, %arg1: i32) -> (i32, i32) {
    %c0_i32 = arith.constant 0 : i32
    %c0_i32_0 = arith.constant 0 : i32
    %c0_i32_1 = arith.constant 0 : i32
    return %c0_i32, %c0_i32_0 : i32, i32
  }
  func.func @transform_3(%arg0: i32, %arg1: i32) -> (i32, i32) {
    %c0_i32 = arith.constant 0 : i32
    %c0_i32_0 = arith.constant 0 : i32
    %c0_i32_1 = arith.constant 0 : i32
    return %c0_i32, %c0_i32_0 : i32, i32
  }
  func.func @transform_4(%arg0: i32, %arg1: i32) -> (i32, i32) {
    %c0_i32 = arith.constant 0 : i32
    %c0_i32_0 = arith.constant 0 : i32
    %c0_i32_1 = arith.constant 0 : i32
    return %c0_i32, %c0_i32_0 : i32, i32
  }
  func.func @transform_5(%arg0: i32, %arg1: i32) -> (i32, i32) {
    %c0_i32 = arith.constant 0 : i32
    %c0_i32_0 = arith.constant 0 : i32
    %c0_i32_1 = arith.constant 0 : i32
    return %c0_i32, %c0_i32_0 : i32, i32
  }
  func.func @transform_6(%arg0: i32, %arg1: i32) -> (i32, i32) {
    %c0_i32 = arith.constant 0 : i32
    %c0_i32_0 = arith.constant 0 : i32
    %c0_i32_1 = arith.constant 0 : i32
    return %c0_i32, %c0_i32_0 : i32, i32
  }
  func.func @transform_7(%arg0: i32, %arg1: i32) -> (i32, i32) {
    %c0_i32 = arith.constant 0 : i32
    %c0_i32_0 = arith.constant 0 : i32
    %c0_i32_1 = arith.constant 0 : i32
    return %c0_i32, %c0_i32_0 : i32, i32
  }
  func.func @transform_8(%arg0: i32, %arg1: i32) -> (i32, i32) {
    %c0_i32 = arith.constant 0 : i32
    %c0_i32_0 = arith.constant 0 : i32
    %c0_i32_1 = arith.constant 0 : i32
    return %c0_i32, %c0_i32_0 : i32, i32
  }
  func.func @transform_9(%arg0: i32, %arg1: i32) -> (i32, i32, i32) {
    %c0_i32 = arith.constant 0 : i32
    %c0_i32_0 = arith.constant 0 : i32
    return %arg0, %arg1, %c0_i32 : i32, i32, i32
  }
}

</mosaic_0001>

<bundles_post_ra>
// kernel: tpu_custom_call.1
= control target key start
LH: loop header
LB: loop body
LE: loop exit
PB: predicated region body
PF: predicated region fallthrough
CT: control target
= control target key end

     0   :  { %s1145_s30 = smov 0   ;;  %s1147_s10 = smov 0   ;;  %s1347_s0 = inlined_call_operand.vmem [shape: f32[2,128,2], index: 0, kind: input, shape index: {}]   ;;  %s1348_s1 = inlined_call_operand.vmem [shape: f32[2,1,32], index: 1, kind: input, shape index: {}]   ;;  %s1349_s2 = inlined_call_operand.vmem [shape: bf16[2,32], index: 2, kind: input, shape index: {}]   ;;  %s1350_s3 = inlined_call_operand.vmem [shape: bf16[32,32], index: 3, kind: input, shape index: {}]   ;;  %s1351_s4 = inlined_call_operand.vmem [shape: f32[1,32], index: 4, kind: input, shape index: {}]   ;;  %s1352_s5 = inlined_call_operand.vmem [shape: bf16[32,32], index: 5, kind: input, shape index: {}]   ;;  %s1353_s6 = inlined_call_operand.vmem [shape: f32[1,32], index: 6, kind: input, shape index: {}]   ;;  %s1354_s7 = inlined_call_operand.vmem [shape: bf16[32,2], index: 7, kind: input, shape index: {}]   ;;  %s1355_s8 = inlined_call_operand.vmem [shape: f32[1,2], index: 8, kind: input, shape index: {}]   ;;  %s1356_s9 = inlined_call_operand.vmem [shape: f32[2,128,2], index: 9, kind: output, shape index: {}]  }
   0x1   :  { %s1149_s11 = smov 0   ;;  %s1151_s12 = smov 0  }
   0x2   :  { %s1153_s13 = smov 0  }
   0x3 LB: > { %s28_s14 = sadd.s32 1, %s1085_s11  ;;  %s31_s15 = sadd.s32 1, %s1089_s12  ;;  %s1093_s13 = sphi %s1153_s13, %s19_s13   ;;  %s1089_s12 = sphi %s1151_s12, %s1360_s12   ;;  %s1085_s11 = sphi %s1149_s11, %s1359_s11   ;;  %s1081_s10 = sphi %s1147_s10, %s1358_s10   ;;  %s1077_s30 = sphi %s1145_s30, %s1357_s30  }
   0x4   : > { %p29_p0 = scmp.ge.s32.totalorder %s28_s14, 2  ;;  %p924_p1 = scmp.ge.s32.totalorder %s1093_s13, 1 }
   0x5   : > { %p316_p2 = scmp.lt.s32.totalorder %s1093_s13, 5 }
   0x6   : > { %s1362_s14 = smov (%p29_p0, %s28_s14), 0  ;;  %s1364_s15 = smov (!%p29_p0, %s31_s15), %s1089_s12 }
   0x7   : > { %p317_p3 = pnand %p924_p1, %p316_p2  ;;  %p33_p4 = scmp.ge.s32.totalorder %s1364_s15, 2 }
   0x8   : > { %s925_s20 = sshll.u32 (!%p317_p3), %s1077_s30, 3  ;;  %p364_p5 = scmp.lt.s32.totalorder (!%p317_p3), %s1081_s10, 1 }
   0x9   : > { %s1366_s15 = smov (%p33_p4, %s1364_s15), 0  ;;  %320 = sbr.rel (%p317_p3) target bundleno = 530 (0x212), region = 56 }
   0xa   : > { %p366_p6 = scmp.lt.s32.totalorder (!%p317_p3), %s925_s20, 15 }
   0xe   : > { %v974_v0 = vld [vmem:[%s1350_s3 + $0x8] sm:$0xff]  ;;  %v404_v1 = vld [vmem:[%s1349_s2] sm:$0x1]  ;;  %vm467_vm0 = vcmask 1040384   ;;  %s1368_s10 = smov (!%p364_p5, %s1081_s10), 1  ;;  %s1370_s20 = smov (!%p366_p6, %s925_s20), 15 }
   0xf   : > { %v973_v2 = vld [vmem:[%s1350_s3] sm:$0xff]  ;;  %v469_v3 = vsel %vm467_vm0, %v404_v1, 0  ;;  %431 = vmatpush.bf16.msra.mxu0 %v974_v0  ;;  %s926_s23 = sshll.u32 %s1368_s10, 4  ;;  %s375_s26 = scalar_lea.vmem %s1348_s1, %s1368_s10  ;;  %vm421_vm1 = vcmask 261120   ;;  %vm454_vm2 = vcmask 15360   ;;  %v976_v18 = vld [vmem:[%s1352_s5 + $0x8] sm:$0xff] }
  0x10   : > { %478 = vmatpush.bf16.msra.mxu1 %v469_v3  ;;  %s1187_s27 = sadd.s32 %s926_s23, %s1370_s20  ;;  %v1019_v4 = vld [vmem:[%s375_s26] ss:$0 sm:$0xff]  ;;  %562 = vmatpush.bf16.msra.mxu2 %v976_v18  ;;  %v978_v1 = vld [vmem:[%s1354_s7 + $0x8] sm:$0xff] }
  0x11   : > { %s927_s28 = sshll.u32 %s1187_s27, 3  ;;  %v403_v5 = vpack.c.bf16 %v1019_v4, %v1019_v4  ;;  %v975_v19 = vld [vmem:[%s1352_s5] sm:$0xff]  ;;  %635 = vmatpush.bf16.msra.mxu3 %v978_v1 }
  0x12   : > { %s371_s16 = scalar_lea.vmem %s1347_s0, %s927_s28  ;;  %v1020_v23 = vld [vmem:[%s1351_s4] ss:$0 sm:$0xff]  ;;  %s1255_s18 = scalar_lea.vmem %s1356_s9, %s927_s28 }
  0x13   : > { %432 = vmatpush.bf16.msra.mxu0 %v973_v2  ;;  %v387_v6 = vld [vmem:[%s371_s16] sm:$0xff]  ;;  %v388_v7 = vld [vmem:[%s371_s16 + $0x8] sm:$0xff]  ;;  %v389_v9 = vld [vmem:[%s371_s16 + $0x10] sm:$0xff] }
  0x14   : > { %v395_v8 = vpack.c.bf16 %v388_v7, %v387_v6  ;;  %v390_v10 = vld [vmem:[%s371_s16 + $0x18] sm:$0xff]  ;;  %v391_v12 = vld [vmem:[%s371_s16 + $0x20] sm:$0xff]  ;;  %v392_v13 = vld [vmem:[%s371_s16 + $0x28] sm:$0xff]  ;;  %563 = vmatpush.bf16.msra.mxu2 %v975_v19 }
  0x15   : > { %v396_v11 = vpack.c.bf16 %v390_v10, %v389_v9  ;;  %v397_v14 = vpack.c.bf16 %v392_v13, %v391_v12  ;;  %v393_v15 = vld [vmem:[%s371_s16 + $0x30] sm:$0xff]  ;;  %v394_v16 = vld [vmem:[%s371_s16 + $0x38] sm:$0xff]  ;;  %v977_v2 = vld [vmem:[%s1354_s7] sm:$0xff] }
  0x16   : > { %939 = vmatmul.msk.bf16.vlgmr.msra.gmra.mxu0 %vm421_vm1, %v403_v5  ;;  %943 = vmatmul.msk.bf16.vlgmr.msra.gmra.mxu1 %vm454_vm2, %v395_v8  ;;  %v398_v17 = vpack.c.bf16 %v394_v16, %v393_v15  ;;  %v1021_v4 = vld [vmem:[%s1353_s6] ss:$0 sm:$0xff] }
  0x17   : > { %636 = vmatpush.bf16.msra.mxu3 %v977_v2 }
  0x26   : > { %940 = vmatmul.msk.bf16.gmra.mxu0 %vm421_vm1, %v403_v5  ;;  %944 = vmatmul.msk.bf16.gmra.mxu1 %vm454_vm2, %v396_v11 }
  0x36   : > { %941 = vmatmul.msk.bf16.gmra.mxu0 %vm421_vm1, %v403_v5  ;;  %945 = vmatmul.msk.bf16.gmra.mxu1 %vm454_vm2, %v397_v14 }
  0x46   : > { %942 = vmatmul.msk.bf16.gmra.mxu0 %vm421_vm1, %v403_v5  ;;  %946 = vmatmul.msk.bf16.gmra.mxu1 %vm454_vm2, %v398_v17 }
  0x93   : > { %v434_v20 = vpop.f32.mrf.mxu0  ;;  %v480_v21 = vpop.f32.mrf.mxu1 }
  0x94   : > { %v481_v22 = vadd.f32 %v480_v21, %v434_v20 }
  0x96   : > { %v504_v26 = vadd.f32 %v1020_v23, %v481_v22 }
  0x98   : > { %v512_v29 = vmax.f32 %v504_v26, 0.0 }
  0x9b   : > { %v436_v24 = vpop.f32.mrf.mxu0  ;;  %v482_v25 = vpop.f32.mrf.mxu1 }
  0x9c   : > { %v483_v27 = vadd.f32 %v482_v25, %v436_v24 }
  0x9e   : > { %v505_v28 = vadd.f32 %v1020_v23, %v483_v27 }
  0xa0   : > { %v513_v30 = vmax.f32 %v505_v28, 0.0 }
  0xa2   : > { %v520_v32 = vpack.c.bf16 %v513_v30, %v512_v29 }
  0xa3   : > { %v439_v31 = vpop.f32.mrf.mxu0  ;;  %v485_v33 = vpop.f32.mrf.mxu1 }
  0xa4   : > { %955 = vmatmul.msk.bf16.vlgmr.msra.gmra.mxu2 %vm421_vm1, %v520_v32  ;;  %v486_v34 = vadd.f32 %v485_v33, %v439_v31  ;;  %v1232_v32 = vld [vmem:[%s1355_s8] ss:$0 sm:$0xff] }
  0xa6   : > { %v506_v37 = vadd.f32 %v1020_v23, %v486_v34 }
  0xa8   : > { %v514_v40 = vmax.f32 %v506_v37, 0.0 }
  0xab   : > { %v441_v35 = vpop.f32.mrf.mxu0  ;;  %v487_v36 = vpop.f32.mrf.mxu1 }
  0xac   : > { %v488_v38 = vadd.f32 %v487_v36, %v441_v35 }
  0xae   : > { %v507_v39 = vadd.f32 %v1020_v23, %v488_v38 }
  0xb0   : > { %v515_v41 = vmax.f32 %v507_v39, 0.0 }
  0xb2   : > { %v521_v43 = vpack.c.bf16 %v515_v41, %v514_v40 }
  0xb3   : > { %v444_v42 = vpop.f32.mrf.mxu0  ;;  %v490_v44 = vpop.f32.mrf.mxu1 }
  0xb4   : > { %956 = vmatmul.msk.bf16.gmra.mxu2 %vm421_vm1, %v521_v43  ;;  %v491_v45 = vadd.f32 %v490_v44, %v444_v42 }
  0xb6   : > { %v508_v48 = vadd.f32 %v1020_v23, %v491_v45 }
  0xb8   : > { %v516_v51 = vmax.f32 %v508_v48, 0.0 }
  0xbb   : > { %v446_v46 = vpop.f32.mrf.mxu0  ;;  %v492_v47 = vpop.f32.mrf.mxu1 }
  0xbc   : > { %v493_v49 = vadd.f32 %v492_v47, %v446_v46 }
  0xbe   : > { %v509_v50 = vadd.f32 %v1020_v23, %v493_v49  ;;  %v658_v49 = vlaneseq }
  0xc0   : > { %v517_v52 = vmax.f32 %v509_v50, 0.0 }
  0xc2   : > { %v522_v54 = vpack.c.bf16 %v517_v52, %v516_v51 }
  0xc3   : > { %v449_v53 = vpop.f32.mrf.mxu0  ;;  %v495_v55 = vpop.f32.mrf.mxu1 }
  0xc4   : > { %957 = vmatmul.msk.bf16.gmra.mxu2 %vm421_vm1, %v522_v54  ;;  %v496_v56 = vadd.f32 %v495_v55, %v449_v53 }
  0xc6   : > { %v510_v59 = vadd.f32 %v1020_v23, %v496_v56  ;;  %v1243_v56 = vand.u32 127, %v658_v49 }
  0xc8   : > { %v518_v62 = vmax.f32 %v510_v59, 0.0  ;;  %vm660_vm4 = vcmp.lt.s32.totalorder %v1243_v56, 1 }
  0xcb   : > { %v451_v57 = vpop.f32.mrf.mxu0  ;;  %v497_v58 = vpop.f32.mrf.mxu1 }
  0xcc   : > { %v498_v60 = vadd.f32 %v497_v58, %v451_v57 }
  0xce   : > { %v511_v61 = vadd.f32 %v1020_v23, %v498_v60 }
  0xd0   : > { %v519_v63 = vmax.f32 %v511_v61, 0.0 }
  0xd2   : > { %v523_v0 = vpack.c.bf16 %v519_v63, %v518_v62 }
  0xd4   : > { %958 = vmatmul.msk.bf16.gmra.mxu2 %vm421_vm1, %v523_v0 }
 0x127   : > { %v565_v3 = vpop.f32.mrf.mxu2 }
 0x128   : > { %v566_v5 = vadd.f32 %v1021_v4, %v565_v3 }
 0x12a   : > { %v585_v8 = vmax.f32 %v566_v5, 0.0 }
 0x12f   : > { %v567_v6 = vpop.f32.mrf.mxu2 }
 0x130   : > { %v568_v7 = vadd.f32 %v1021_v4, %v567_v6 }
 0x132   : > { %v586_v9 = vmax.f32 %v568_v7, 0.0 }
 0x134   : > { %v593_v10 = vpack.c.bf16 %v586_v9, %v585_v8 }
 0x136   : > { %967 = vmatmul.msk.bf16.vlgmr.msra.gmra.mxu3 %vm421_vm1, %v593_v10 }
 0x137   : > { %v570_v11 = vpop.f32.mrf.mxu2 }
 0x138   : > { %v571_v12 = vadd.f32 %v1021_v4, %v570_v11 }
 0x13a   : > { %v587_v15 = vmax.f32 %v571_v12, 0.0 }
 0x13f   : > { %v572_v13 = vpop.f32.mrf.mxu2 }
 0x140   : > { %v573_v14 = vadd.f32 %v1021_v4, %v572_v13 }
 0x142   : > { %v588_v16 = vmax.f32 %v573_v14, 0.0 }
 0x144   : > { %v594_v17 = vpack.c.bf16 %v588_v16, %v587_v15 }
 0x146   : > { %968 = vmatmul.msk.bf16.gmra.mxu3 %vm421_vm1, %v594_v17 }
 0x147   : > { %v575_v18 = vpop.f32.mrf.mxu2 }
 0x148   : > { %v576_v19 = vadd.f32 %v1021_v4, %v575_v18 }
 0x14a   : > { %v589_v22 = vmax.f32 %v576_v19, 0.0 }
 0x14f   : > { %v577_v20 = vpop.f32.mrf.mxu2 }
 0x150   : > { %v578_v21 = vadd.f32 %v1021_v4, %v577_v20 }
 0x152   : > { %v590_v23 = vmax.f32 %v578_v21, 0.0 }
 0x154   : > { %v595_v24 = vpack.c.bf16 %v590_v23, %v589_v22 }
 0x156   : > { %969 = vmatmul.msk.bf16.gmra.mxu3 %vm421_vm1, %v595_v24 }
 0x157   : > { %v580_v25 = vpop.f32.mrf.mxu2 }
 0x158   : > { %v581_v26 = vadd.f32 %v1021_v4, %v580_v25 }
 0x15a   : > { %v591_v29 = vmax.f32 %v581_v26, 0.0 }
 0x15f   : > { %v582_v27 = vpop.f32.mrf.mxu2 }
 0x160   : > { %v583_v28 = vadd.f32 %v1021_v4, %v582_v27 }
 0x162   : > { %v592_v30 = vmax.f32 %v583_v28, 0.0 }
 0x164   : > { %v596_v31 = vpack.c.bf16 %v592_v30, %v591_v29 }
 0x166   : > { %970 = vmatmul.msk.bf16.gmra.mxu3 %vm421_vm1, %v596_v31 }
 0x1b9   : > { %v638_v33 = vpop.f32.mrf.mxu3 }
 0x1ba   : > { %v639_v34 = vadd.f32 %v1232_v32, %v638_v33 }
 0x1bc   : > { %v685_v35 = vand.u32 2147483647, %v639_v34  ;;  %v661_v63 = vmax.f32 %v639_v34, 0.0  ;;  %vm669_vm5 = vcmp.ne.f32.partialorder %v639_v34, %v639_v34 }
 0x1be   : > { %v693_v36 = vsub.f32 0.0, %v685_v35 }
 0x1c0   : > { %v701_v37 = vmul.f32 1.442695, %v693_v36 }
 0x1c1   : > { %v640_v38 = vpop.f32.mrf.mxu3 }
 0x1c2   : > { %1023 = vpow2.f32 %v701_v37  ;;  %v1236_v39 = vadd.f32 %v1232_v32, %v640_v38 }
 0x1c4   : > { %v686_v40 = vand.u32 2147483647, %v1236_v39  ;;  %v662_v17 = vmax.f32 %v1236_v39, 0.0  ;;  %vm670_vm7 = vcmp.ne.f32.partialorder %v1236_v39, %v1236_v39 }
 0x1c6   : > { %v694_v41 = vsub.f32 0.0, %v686_v40 }
 0x1c8   : > { %v1024_v42 = vpop.eup %1023  ;;  %v703_v43 = vmul.f32 1.442695, %v694_v41 }
 0x1c9   : > { %v717_v44 = vadd.f32 1.0, %v1024_v42  ;;  %v720_v45 = vmul.f32 -0.5, %v1024_v42  ;;  %v643_v46 = vpop.f32.mrf.mxu3  ;;  %v723_v52 = vand.u32 2147483647, %v1024_v42 }
 0x1ca   : > { %1025 = vpow2.f32 %v703_v43  ;;  %v1240_v47 = vadd.f32 %v1232_v32, %v643_v46 }
 0x1cb   : > { %1027 = vlog2.f32 %v717_v44  ;;  %v721_v50 = vadd.f32 1.0, %v720_v45  ;;  %vm724_vm3 = vcmp.lt.f32.partialorder %v723_v52, 0.0004427343 }
 0x1cc   : > { %v687_v48 = vand.u32 2147483647, %v1240_v47  ;;  %v663_v36 = vmax.f32 %v1240_v47, 0.0  ;;  %vm671_vm9 = vcmp.ne.f32.partialorder %v1240_v47, %v1240_v47 }
 0x1cd   : > { %v722_v57 = vmul.f32 %v1024_v42, %v721_v50 }
 0x1ce   : > { %v695_v51 = vsub.f32 0.0, %v687_v48 }
 0x1d0   : > { %v1026_v53 = vpop.eup %1025  ;;  %v705_v54 = vmul.f32 1.442695, %v695_v51 }
 0x1d1   : > { %v1028_v55 = vpop.eup %1027  ;;  %v726_v58 = vadd.f32 1.0, %v1026_v53  ;;  %v645_v59 = vpop.f32.mrf.mxu3  ;;  %v729_v61 = vmul.f32 -0.5, %v1026_v53  ;;  %v732_v6 = vand.u32 2147483647, %v1026_v53 }
 0x1d2   : > { %v719_v60 = vmul.f32 0.6931472, %v1028_v55  ;;  %1029 = vpow2.f32 %v705_v54  ;;  %v1246_v62 = vadd.f32 %v1232_v32, %v645_v59 }
 0x1d3   : > { %1031 = vlog2.f32 %v726_v58  ;;  %v730_v3 = vadd.f32 1.0, %v729_v61  ;;  %vm733_vm6 = vcmp.lt.f32.partialorder %v732_v6, 0.0004427343 }
 0x1d4   : > { %v725_v0 = vsel %vm724_vm3, %v722_v57, %v719_v60  ;;  %v688_v1 = vand.u32 2147483647, %v1246_v62  ;;  %v664_v55 = vmax.f32 %v1246_v62, 0.0  ;;  %vm672_vm11 = vcmp.ne.f32.partialorder %v1246_v62, %v1246_v62 }
 0x1d5   : > { %v789_v2 = vadd.f32 %v725_v0, %v661_v63  ;;  %v731_v15 = vmul.f32 %v1026_v53, %v730_v3 }
 0x1d6   : > { %v696_v4 = vsub.f32 0.0, %v688_v1 }
 0x1d7   : > { %v797_v5 = vsel %vm669_vm5, %v639_v34, %v789_v2 }
 0x1d8   : > { %v1030_v7 = vpop.eup %1029  ;;  %v805_v8 = vsel %vm660_vm4, %v639_v34, %v797_v5  ;;  %v707_v9 = vmul.f32 1.442695, %v696_v4 }
 0x1d9   : > { %v1032_v10 = vpop.eup %1031  ;;  %813 = vst.msk [vmem:[%s1255_s18] sm:$0xff] %vm454_vm2, %v805_v8  ;;  %v735_v11 = vadd.f32 1.0, %v1030_v7  ;;  %v738_v12 = vmul.f32 -0.5, %v1030_v7  ;;  %v648_v13 = vpop.f32.mrf.mxu3  ;;  %v741_v24 = vand.u32 2147483647, %v1030_v7 }
 0x1da   : > { %v728_v14 = vmul.f32 0.6931472, %v1032_v10  ;;  %1033 = vpow2.f32 %v707_v9  ;;  %v1262_v16 = vadd.f32 %v1232_v32, %v648_v13 }
 0x1db   : > { %1035 = vlog2.f32 %v735_v11  ;;  %v739_v21 = vadd.f32 1.0, %v738_v12  ;;  %vm742_vm8 = vcmp.lt.f32.partialorder %v741_v24, 0.0004427343 }
 0x1dc   : > { %v734_v18 = vsel %vm733_vm6, %v731_v15, %v728_v14  ;;  %v689_v19 = vand.u32 2147483647, %v1262_v16  ;;  %v665_v10 = vmax.f32 %v1262_v16, 0.0  ;;  %vm673_vm13 = vcmp.ne.f32.partialorder %v1262_v16, %v1262_v16 }
 0x1dd   : > { %v790_v20 = vadd.f32 %v734_v18, %v662_v17  ;;  %v740_v29 = vmul.f32 %v1030_v7, %v739_v21 }
 0x1de   : > { %v697_v22 = vsub.f32 0.0, %v689_v19 }
 0x1df   : > { %v798_v23 = vsel %vm670_vm7, %v1236_v39, %v790_v20 }
 0x1e0   : > { %v1034_v25 = vpop.eup %1033  ;;  %v806_v26 = vsel %vm660_vm4, %v1236_v39, %v798_v23  ;;  %v709_v27 = vmul.f32 1.442695, %v697_v22 }
 0x1e1   : > { %v1036_v28 = vpop.eup %1035  ;;  %814 = vst.msk [vmem:[%s1255_s18 + $0x8] sm:$0xff] %vm454_vm2, %v806_v26  ;;  %v744_v30 = vadd.f32 1.0, %v1034_v25  ;;  %v650_v31 = vpop.f32.mrf.mxu3  ;;  %v747_v34 = vmul.f32 -0.5, %v1034_v25  ;;  %v750_v43 = vand.u32 2147483647, %v1034_v25 }
 0x1e2   : > { %v737_v33 = vmul.f32 0.6931472, %v1036_v28  ;;  %1037 = vpow2.f32 %v709_v27  ;;  %v1275_v35 = vadd.f32 %v1232_v32, %v650_v31 }
 0x1e3   : > { %1039 = vlog2.f32 %v744_v30  ;;  %v748_v40 = vadd.f32 1.0, %v747_v34  ;;  %vm751_vm10 = vcmp.lt.f32.partialorder %v750_v43, 0.0004427343 }
 0x1e4   : > { %v743_v37 = vsel %vm742_vm8, %v740_v29, %v737_v33  ;;  %v690_v38 = vand.u32 2147483647, %v1275_v35  ;;  %vm674_vm15 = vcmp.ne.f32.partialorder %v1275_v35, %v1275_v35 }
 0x1e5   : > { %v791_v39 = vadd.f32 %v743_v37, %v663_v36  ;;  %v749_v53 = vmul.f32 %v1034_v25, %v748_v40  ;;  %v666_v25 = vmax.f32 %v1275_v35, 0.0 }
 0x1e6   : > { %v698_v41 = vsub.f32 0.0, %v690_v38 }
 0x1e7   : > { %v799_v42 = vsel %vm671_vm9, %v1240_v47, %v791_v39 }
 0x1e8   : > { %v1038_v44 = vpop.eup %1037  ;;  %v807_v45 = vsel %vm660_vm4, %v1240_v47, %v799_v42  ;;  %v711_v46 = vmul.f32 1.442695, %v698_v41 }
 0x1e9   : > { %v1040_v48 = vpop.eup %1039  ;;  %815 = vst.msk [vmem:[%s1255_s18 + $0x10] sm:$0xff] %vm454_vm2, %v807_v45  ;;  %v753_v49 = vadd.f32 1.0, %v1038_v44  ;;  %v756_v50 = vmul.f32 -0.5, %v1038_v44  ;;  %v653_v51 = vpop.f32.mrf.mxu3  ;;  %v759_v63 = vand.u32 2147483647, %v1038_v44 }
 0x1ea   : > { %v746_v52 = vmul.f32 0.6931472, %v1040_v48  ;;  %1041 = vpow2.f32 %v711_v46  ;;  %v1288_v54 = vadd.f32 %v1232_v32, %v653_v51 }
 0x1eb   : > { %1043 = vlog2.f32 %v753_v49  ;;  %v757_v59 = vadd.f32 1.0, %v756_v50  ;;  %vm760_vm12 = vcmp.lt.f32.partialorder %v759_v63, 0.0004427343 }
 0x1ec   : > { %v752_v57 = vsel %vm751_vm10, %v749_v53, %v746_v52  ;;  %v691_v47 = vand.u32 2147483647, %v1288_v54  ;;  %v667_v39 = vmax.f32 %v1288_v54, 0.0  ;;  %vm675_vm1 = vcmp.ne.f32.partialorder %v1288_v54, %v1288_v54 }
 0x1ed   : > { %v792_v58 = vadd.f32 %v752_v57, %v664_v55  ;;  %v758_v4 = vmul.f32 %v1038_v44, %v757_v59 }
 0x1ee   : > { %v699_v60 = vsub.f32 0.0, %v691_v47 }
 0x1ef   : > { %v800_v61 = vsel %vm672_vm11, %v1246_v62, %v792_v58 }
 0x1f0   : > { %v1042_v0 = vpop.eup %1041  ;;  %v808_v1 = vsel %vm660_vm4, %v1246_v62, %v800_v61  ;;  %v713_v2 = vmul.f32 1.442695, %v699_v60 }
 0x1f1   : > { %v1044_v3 = vpop.eup %1043  ;;  %816 = vst.msk [vmem:[%s1255_s18 + $0x18] sm:$0xff] %vm454_vm2, %v808_v1  ;;  %v762_v5 = vadd.f32 1.0, %v1042_v0  ;;  %v655_v6 = vpop.f32.mrf.mxu3  ;;  %v765_v8 = vmul.f32 -0.5, %v1042_v0  ;;  %v768_v17 = vand.u32 2147483647, %v1042_v0 }
 0x1f2   : > { %v755_v7 = vmul.f32 0.6931472, %v1044_v3  ;;  %1045 = vpow2.f32 %v713_v2  ;;  %v656_v9 = vadd.f32 %v1232_v32, %v655_v6 }
 0x1f3   : > { %1047 = vlog2.f32 %v762_v5  ;;  %v766_v13 = vadd.f32 1.0, %v765_v8  ;;  %vm769_vm14 = vcmp.lt.f32.partialorder %v768_v17, 0.0004427343 }
 0x1f4   : > { %v761_v11 = vsel %vm760_vm12, %v758_v4, %v755_v7  ;;  %v692_v12 = vand.u32 2147483647, %v656_v9  ;;  %v668_v49 = vmax.f32 %v656_v9, 0.0  ;;  %vm676_vm5 = vcmp.ne.f32.partialorder %v656_v9, %v656_v9 }
 0x1f5   : > { %v793_v62 = vadd.f32 %v761_v11, %v665_v10  ;;  %v767_v23 = vmul.f32 %v1042_v0, %v766_v13 }
 0x1f6   : > { %v700_v14 = vsub.f32 0.0, %v692_v12 }
 0x1f7   : > { %v801_v15 = vsel %vm673_vm13, %v1262_v16, %v793_v62 }
 0x1f8   : > { %v1046_v18 = vpop.eup %1045  ;;  %v809_v32 = vsel %vm660_vm4, %v1262_v16, %v801_v15  ;;  %v715_v19 = vmul.f32 1.442695, %v700_v14 }
 0x1f9   : > { %v1048_v20 = vpop.eup %1047  ;;  %817 = vst.msk [vmem:[%s1255_s18 + $0x20] sm:$0xff] %vm454_vm2, %v809_v32  ;;  %v771_v21 = vadd.f32 1.0, %v1046_v18  ;;  %v774_v24 = vmul.f32 -0.5, %v1046_v18  ;;  %v777_v29 = vand.u32 2147483647, %v1046_v18 }
 0x1fa   : > { %v764_v22 = vmul.f32 0.6931472, %v1048_v20  ;;  %1049 = vpow2.f32 %v715_v19 }
 0x1fb   : > { %1051 = vlog2.f32 %v771_v21  ;;  %v775_v16 = vadd.f32 1.0, %v774_v24  ;;  %vm778_vm0 = vcmp.lt.f32.partialorder %v777_v29, 0.0004427343 }
 0x1fc   : > { %v770_v26 = vsel %vm769_vm14, %v767_v23, %v764_v22 }
 0x1fd   : > { %v794_v27 = vadd.f32 %v770_v26, %v666_v25  ;;  %v776_v37 = vmul.f32 %v1046_v18, %v775_v16 }
 0x1ff   : > { %v802_v28 = vsel %vm674_vm15, %v1275_v35, %v794_v27 }
 0x200   : > { %v1050_v30 = vpop.eup %1049  ;;  %v810_v31 = vsel %vm660_vm4, %v1275_v35, %v802_v28 }
 0x201   : > { %v1052_v33 = vpop.eup %1051  ;;  %818 = vst.msk [vmem:[%s1255_s18 + $0x28] sm:$0xff] %vm454_vm2, %v810_v31  ;;  %v780_v34 = vadd.f32 1.0, %v1050_v30  ;;  %v783_v38 = vmul.f32 -0.5, %v1050_v30  ;;  %v786_v43 = vand.u32 2147483647, %v1050_v30 }
 0x202   : > { %v773_v36 = vmul.f32 0.6931472, %v1052_v33 }
 0x203   : > { %1053 = vlog2.f32 %v780_v34  ;;  %v784_v42 = vadd.f32 1.0, %v783_v38  ;;  %vm787_vm3 = vcmp.lt.f32.partialorder %v786_v43, 0.0004427343 }
 0x204   : > { %v779_v40 = vsel %vm778_vm0, %v776_v37, %v773_v36 }
 0x205   : > { %v795_v41 = vadd.f32 %v779_v40, %v667_v39  ;;  %v785_v48 = vmul.f32 %v1050_v30, %v784_v42 }
 0x207   : > { %v803_v35 = vsel %vm675_vm1, %v1288_v54, %v795_v41 }
 0x208   : > { %v811_v44 = vsel %vm660_vm4, %v1288_v54, %v803_v35 }
 0x209   : > { %v1054_v45 = vpop.eup %1053  ;;  %819 = vst.msk [vmem:[%s1255_s18 + $0x30] sm:$0xff] %vm454_vm2, %v811_v44 }
 0x20a   : > { %v782_v46 = vmul.f32 0.6931472, %v1054_v45 }
 0x20c   : > { %v788_v50 = vsel %vm787_vm3, %v785_v48, %v782_v46 }
 0x20d   : > { %v796_v51 = vadd.f32 %v788_v50, %v668_v49 }
 0x20f   : > { %v804_v52 = vsel %vm676_vm5, %v656_v9, %v796_v51 }
 0x210   : > { %v812_v53 = vsel %vm660_vm4, %v656_v9, %v804_v52 }
 0x211   : > { %820 = vst.msk [vmem:[%s1255_s18 + $0x38] sm:$0xff] %vm454_vm2, %v812_v53 }
 0x212 PF: > { %s19_s13 = sadd.s32 1, %s1093_s13   ;;  %s1357_s30 = smov %s1085_s11 }
 0x213   : > { %p16_p7 = scmp.ge.s32.totalorder %s19_s13, 6   ;;  %s1358_s10 = smov %s1089_s12 }
 0x214   : > { %s1359_s11 = smov %s1362_s14  ;;  %s1360_s12 = smov %s1366_s15 }
 0x215   :  { %18 = sbr.rel (!%p16_p7) target bundleno = 3 (0x3), region = 89 }

</bundles_post_ra>
